<compile_context>
chip_gen: v5e
topology: v5e:2x2
jax: 0.10.0
libtpu: 0.0.40
codegen_flags: <defaults>
</compile_context>

<pallas_src>
import math

import jax
import jax.numpy as jnp
from jax.experimental import pallas as pl
from jax.experimental.pallas import tpu as pltpu


_VMEM_BUDGET = 14 * 1024 * 1024   # fits v5e's 16 MiB scoped default with margin


def _round_up(x, m):
    return ((x + m - 1) // m) * m


def _proj_kernel(a_ref, w_ref, bias_ref, o_ref):
    # One-shot tile: (tm, K) @ (K, tn) on the MXU, f32 accumulate, bias add and
    # downcast fused into the store.  No reduction axis, no scratch, no pl.when.
    o_ref[...] = (
        jnp.dot(a_ref[...], w_ref[...], preferred_element_type=jnp.float32)
        + bias_ref[...]
    ).astype(o_ref.dtype)


def _tile_vmem_bytes(tm, tn, K, a_bytes, w_bytes, o_bytes):
    # Every BlockSpec stream is double-buffered by the pipeline.
    return 2 * (tm * K * a_bytes + K * tn * w_bytes + tn * 4 + tm * tn * o_bytes)


def _pick_tiles(M, N, K, a_bytes, w_bytes, o_bytes):
    """Choose (tm, Mp, tn, Np): lane-dense tiles that avoid padding the big
    patches matrix and keep the double-buffered working set inside VMEM."""
    # --- N (embed_dim): one full-N column block whenever it is small enough,
    # so the weight is fetched exactly once and stays VMEM-resident.
    if N <= 1024:
        tn, Np = N, N
    else:
        tn = next((t for t in (512, 256, 128) if N % t == 0), None)
        if tn is None:
            Np = _round_up(N, 128)              # rare fallback: pad weight cols
            tn = next(t for t in (512, 256, 128) if Np % t == 0)
        else:
            Np = N

    # --- M (B*gh*gw): big tiles, but >=2 tiles when possible so both v7x
    # TensorCores get work; never pad M unless nothing (8,·)-aligned divides it.
    if M > 1024:
        tm = next((t for t in (512, 384, 256, 128, 64, 32, 16, 8) if M % t == 0),
                  None)
        if tm is None:
            Mp, tm = _round_up(M, 256), 256     # rare fallback: pad patch rows
        else:
            Mp = M
    elif M >= 256 and M % 16 == 0:
        tm, Mp = M // 2, M                      # two parallel M tiles
    else:
        tm, Mp = M, M                           # single full-M block

    # --- Shrink tm if the working set would exceed the scoped-VMEM budget
    # (halving preserves divisibility of Mp and (8,·)-alignment).
    while (_tile_vmem_bytes(tm, tn, K, a_bytes, w_bytes, o_bytes) > _VMEM_BUDGET
           and tm % 16 == 0 and tm >= 32):
        tm //= 2
    # TODO(synk): a K-tiled reduction-axis fallback would be needed if K*tn
    #             alone approached the budget; PatchEmbed (K = C*ph*pw) never
    #             gets there.
    return tm, Mp, tn, Np


def _matmul_bias(a, w2d, bias, *, out_dtype):
    """a: (M, K), w2d: (K, N), bias: (N,)  ->  (M, N) = a @ w2d + bias."""
    M, K = a.shape
    K2, N = w2d.shape
    assert K == K2 and bias.shape == (N,)

    a_bytes = a.dtype.itemsize
    w_bytes = w2d.dtype.itemsize
    o_bytes = jnp.dtype(out_dtype).itemsize
    tm, Mp, tn, Np = _pick_tiles(M, N, K, a_bytes, w_bytes, o_bytes)

    bias2d = bias.astype(jnp.float32).reshape(1, N)
    if Mp != M:        # rare fallback only (costs one extra pass over `a`)
        a = jnp.pad(a, ((0, Mp - M), (0, 0)))
    if Np != N:        # rare fallback only (weight/bias are small)
        w2d = jnp.pad(w2d, ((0, 0), (0, Np - N)))
        bias2d = jnp.pad(bias2d, ((0, 0), (0, Np - N)))

    # M outer / N inner: A is streamed through exactly once; the weight/bias
    # block index is constant whenever Np == tn, so it is DMA'd only once.
    grid = (Mp // tm, Np // tn)

    out = pl.pallas_call(
        _proj_kernel,
        out_shape=jax.ShapeDtypeStruct((Mp, Np), out_dtype),
        grid_spec=pltpu.PrefetchScalarGridSpec(
            num_scalar_prefetch=0,
            grid=grid,
            in_specs=[
                pl.BlockSpec((tm, K), lambda i, j: (i, 0)),
                pl.BlockSpec((K, tn), lambda i, j: (0, j)),
                pl.BlockSpec((1, tn), lambda i, j: (0, j)),
            ],
            out_specs=pl.BlockSpec((tm, tn), lambda i, j: (i, j)),
        ),
        compiler_params=pltpu.CompilerParams(
            dimension_semantics=("parallel", "parallel"),
        ),
    )(a, w2d, bias2d)

    if Mp != M or Np != N:
        out = out[:M, :N]
    return out


def patch_embed(x, weight, bias, *, patch_size, patch_stride, flatten=True,
                compute_dtype=jnp.bfloat16):
    """PatchEmbed.forward for the module's default configuration.

    x:      (B, C, H, W)
    weight: (E, C, ph, pw)   -- PyTorch Conv2d weight layout
    bias:   (E,) or None
    Returns (B, num_patches, E) when flatten=True, else (B, E, gh, gw).
    norm_layer=None in the spec -> nn.Identity(), so nothing to apply after.
    """
    B, C, H, W = x.shape
    E, Cw, ph, pw = weight.shape
    sh, sw = patch_stride
    assert Cw == C and (ph, pw) == tuple(patch_size)
    # TODO(synk): overlapping patches (patch_stride != patch_size, which implies
    #             nonzero conv padding) and the LoRA conv option are not
    #             implemented; the module defaults (stride == patch_size =>
    #             padding 0, plain Conv2d) are.
    assert (ph, pw) == (sh, sw), "only non-overlapping patchify is supported"
    assert H % ph == 0 and W % pw == 0

    gh, gw = H // ph, W // pw
    # im2col for a stride==kernel conv is pure layout work; the bf16 cast fuses
    # into the same transpose pass (halves A-matrix DMA bytes into the kernel).
    # TODO(synk): an NHWC input path would let this transpose move pw*C
    #             contiguous chunks instead of pw; not available from the NCHW
    #             PyTorch layout handled here.
    patches = (
        x.reshape(B, C, gh, ph, gw, pw)
        .transpose(0, 2, 4, 1, 3, 5)           # (B, gh, gw, C, ph, pw)
        .reshape(B * gh * gw, C * ph * pw)     # (M, K), K in (c, u, v) order
        .astype(compute_dtype)
    )
    w2d = weight.reshape(E, C * ph * pw).T.astype(compute_dtype)   # (K, E)
    if bias is None:
        bias = jnp.zeros((E,), jnp.float32)

    out = _matmul_bias(patches, w2d, bias, out_dtype=x.dtype)      # (B*gh*gw, E)

    if flatten:
        # == conv_out.flatten(2).transpose(1, 2) of the PyTorch module.
        return out.reshape(B, gh * gw, E)
    return out.reshape(B, gh, gw, E).transpose(0, 3, 1, 2)


def patch_embed_reference(x, weight, bias, *, patch_size, patch_stride,
                          flatten=True):
    """Pure-JAX reference mirroring the PyTorch forward exactly (f32 HIGHEST)."""
    del patch_size  # stride == kernel, padding 0
    out = jax.lax.conv_general_dilated(
        x, weight, window_strides=patch_stride, padding="VALID",
        dimension_numbers=("NCHW", "OIHW", "NCHW"),
        precision=jax.lax.Precision.HIGHEST)
    out = out + bias[None, :, None, None]
    if flatten:
        B, E, gh, gw = out.shape
        out = out.reshape(B, E, gh * gw).transpose(0, 2, 1)
    return out


if __name__ == "__main__":
    root_key = jax.random.PRNGKey(0)

    def run_case(case_id, B, C, H, W, p, E):
        kx, kw_, kb = jax.random.split(jax.random.fold_in(root_key, case_id), 3)
        x = jax.random.normal(kx, (B, C, H, W), jnp.float32)
        fan_in = C * p * p
        weight = jax.random.normal(kw_, (E, C, p, p), jnp.float32) / math.sqrt(fan_in)
        bias = 0.02 * jax.random.normal(kb, (E,), jnp.float32)

        out = patch_embed(x, weight, bias,
                          patch_size=(p, p), patch_stride=(p, p))
        out = jax.block_until_ready(out)

        ref = patch_embed_reference(x, weight, bias,
                                    patch_size=(p, p), patch_stride=(p, p))
        gh, gw = H // p, W // p
        assert out.shape == (B, gh * gw, E), out.shape
        assert out.dtype == x.dtype, out.dtype
        # bf16 MXU operands with f32 accumulation vs. a full-f32 conv reference.
        err = float(jnp.max(jnp.abs(out - ref)))
        assert err < 5e-2, err

    # Small case: single-tile grid, full-K / full-M / full-N blocks.
    run_case(0, B=2, C=4, H=16, W=16, p=4, E=32)
    # Larger case: 2 parallel M tiles x 1 N tile (M=256, K=192, E=192), no padding.
    run_case(1, B=4, C=3, H=64, W=64, p=8, E=192)

    print("KERNEL_OK")
</pallas_src>

<mosaic_0001>
module attributes {stable_mosaic.version = 11 : i64} {
  func.func @_proj_kernel(%arg0: i32, %arg1: i32, %arg2: memref<32x64xbf16, #tpu.memory_space<vmem>>, %arg3: memref<64x32xbf16, #tpu.memory_space<vmem>>, %arg4: memref<1x32xf32, #tpu.memory_space<vmem>>, %arg5: memref<32x32xf32, #tpu.memory_space<vmem>>) attributes {dimension_semantics = [#tpu.dimension_semantics<parallel>, #tpu.dimension_semantics<parallel>], iteration_bounds = array<i64: 1, 1>, scalar_prefetch = 0 : i64, scratch_operands = 0 : i64, tpu.core_type = #tpu.core_type<tc>, window_params = [{transform_indices = @transform_0, window_bounds = array<i64: 32, 64>}, {transform_indices = @transform_1, window_bounds = array<i64: 64, 32>}, {transform_indices = @transform_2, window_bounds = array<i64: 1, 32>}, {transform_indices = @transform_3, window_bounds = array<i64: 32, 32>}]} {
    %c0 = arith.constant 0 : index
    %c0_0 = arith.constant 0 : index
    %0 = vector.load %arg2[%c0, %c0_0] : memref<32x64xbf16, #tpu.memory_space<vmem>>, vector<32x64xbf16>
    %c0_1 = arith.constant 0 : index
    %c0_2 = arith.constant 0 : index
    %1 = vector.load %arg3[%c0_1, %c0_2] : memref<64x32xbf16, #tpu.memory_space<vmem>>, vector<64x32xbf16>
    %cst = arith.constant dense<0.000000e+00> : vector<32x32xf32>
    %2 = tpu.matmul %0, %1, %cst {dimension_numbers = #tpu.dot_dimension_numbers<[1], [0], [0], [1], [0, 0, 1, 1], [], []>} : vector<32x64xbf16>, vector<64x32xbf16>, vector<32x32xf32> -> vector<32x32xf32>
    %c0_3 = arith.constant 0 : index
    %c0_4 = arith.constant 0 : index
    %3 = vector.load %arg4[%c0_3, %c0_4] : memref<1x32xf32, #tpu.memory_space<vmem>>, vector<1x32xf32>
    %4 = vector.broadcast %3 : vector<1x32xf32> to vector<32x32xf32>
    %5 = arith.addf %2, %4 : vector<32x32xf32>
    %c0_5 = arith.constant 0 : index
    %c0_6 = arith.constant 0 : index
    %6 = vector.load %arg5[%c0_5, %c0_6] : memref<32x32xf32, #tpu.memory_space<vmem>>, vector<32x32xf32>
    tpu.vector_store %arg5[%c0_5, %c0_6], %5 {strides = array<i32>} : memref<32x32xf32, #tpu.memory_space<vmem>>, vector<32x32xf32>,
    return
  }
  func.func @transform_0(%arg0: i32, %arg1: i32) -> (i32, i32) {
    %c0_i32 = arith.constant 0 : i32
    %c0_i32_0 = arith.constant 0 : i32
    return %arg0, %c0_i32 : i32, i32
  }
  func.func @transform_1(%arg0: i32, %arg1: i32) -> (i32, i32) {
    %c0_i32 = arith.constant 0 : i32
    %c0_i32_0 = arith.constant 0 : i32
    return %c0_i32, %arg1 : i32, i32
  }
  func.func @transform_2(%arg0: i32, %arg1: i32) -> (i32, i32) {
    %c0_i32 = arith.constant 0 : i32
    %c0_i32_0 = arith.constant 0 : i32
    return %c0_i32, %arg1 : i32, i32
  }
  func.func @transform_3(%arg0: i32, %arg1: i32) -> (i32, i32) {
    %c0_i32 = arith.constant 0 : i32
    return %arg0, %arg1 : i32, i32
  }
}

</mosaic_0001>

<bundles_post_ra>
// kernel: tpu_custom_call.1
= control target key start
LH: loop header
LB: loop body
LE: loop exit
PB: predicated region body
PF: predicated region fallthrough
CT: control target
= control target key end

     0   :  { %s232_s0 = inlined_call_operand.vmem [shape: bf16[32,64], index: 0, kind: input, shape index: {}]   ;;  %s233_s1 = inlined_call_operand.vmem [shape: bf16[64,32], index: 1, kind: input, shape index: {}]   ;;  %s234_s2 = inlined_call_operand.vmem [shape: f32[1,32], index: 2, kind: input, shape index: {}]   ;;  %s235_s3 = inlined_call_operand.hbm [shape: f32[32,32], index: 3, kind: output, shape index: {}]  }
   0x1   :  { %v146_v0 = vld [vmem:[%s233_s1 + $0x18] sm:$0xff]  ;;  %v145_v1 = vld [vmem:[%s233_s1 + $0x10] sm:$0xff] }
   0x2   :  { %77 = vmatpush.bf16.msra.mxu0 %v146_v0  ;;  %147 = vmatpush.bf16.msra.mxu1 %v146_v0 }
   0x3   :  { %8 = vsyncpa [#allocation3], 0  ;;  %v144_v2 = vld [vmem:[%s233_s1 + $0x8] sm:$0xff]  ;;  %v143_v3 = vld [vmem:[%s233_s1] sm:$0xff]  ;;  %vm66_vm0 = vcmask 523264   ;;  %vm92_vm1 = vcmask 261120  }
   0x4   :  { %v141_v4 = vld [vmem:[%s232_s0] sm:$0xff]  ;;  %v142_v5 = vld [vmem:[%s232_s0 + $0x8] sm:$0xff]  ;;  %s181_s1 = smov [#allocation2]   ;;  %s103_s28 = sshll.u32 %s235_s3, 4  ;;  %s104_s28 = int_to_ptr.hbm [resolvable:$true] %s103_s28 }
   0x5   :  { %v154_v6 = vld [vmem:[%s234_s2] ss:$0 sm:$0xff]  ;;  %s101_s0 = sshll.u32 %s181_s1, 4  ;;  %s182_s2 = smov 128   ;;  %s102_s0 = int_to_ptr.vmem [resolvable:$true] %s101_s0 }
   0x6   :  { %78 = vmatpush.bf16.msra.mxu0 %v145_v1  ;;  %148 = vmatpush.bf16.msra.mxu1 %v145_v1  ;;  %s183_s29 = smov 8  }
   0xa   :  { %79 = vmatpush.bf16.msra.mxu0 %v144_v2  ;;  %149 = vmatpush.bf16.msra.mxu1 %v144_v2 }
   0xe   :  { %80 = vmatpush.bf16.msra.mxu0 %v143_v3  ;;  %150 = vmatpush.bf16.msra.mxu1 %v143_v3 }
  0x11   :  { %139 = vmatmul.msk.bf16.vlgmr.msra.gmra.mxu0 %vm66_vm0, %v141_v4  ;;  %140 = vmatmul.msk.bf16.vlgmr.msra.gmra.mxu1 %vm66_vm0, %v142_v5 }
  0x8e   :  { %v82_v7 = vpop.f32.mrf.mxu0  ;;  %v87_v8 = vpop.f32.mrf.mxu1 }
  0x8f   :  { %v83_v9 = vadd.f32 %v154_v6, %v82_v7  ;;  %v88_v10 = vadd.f32 %v154_v6, %v87_v8 }
  0x91   :  { %93 = vst.msk [vmem:[#allocation2] sm:$0xff] %vm92_vm1, %v83_v9 }
  0x92   :  { %95 = vst.msk [vmem:[#allocation2 + $0x10] sm:$0xff] %vm92_vm1, %v88_v10 }
  0x96   :  { %v84_v11 = vpop.f32.mrf.mxu0  ;;  %v89_v12 = vpop.f32.mrf.mxu1 }
  0x97   :  { %v85_v13 = vadd.f32 %v154_v6, %v84_v11  ;;  %v90_v14 = vadd.f32 %v154_v6, %v89_v12 }
  0x99   :  { %94 = vst.msk [vmem:[#allocation2 + $0x8] sm:$0xff] %vm92_vm1, %v85_v13 }
  0x9a   :  { %96 = vst.msk [vmem:[#allocation2 + $0x18] sm:$0xff] %vm92_vm1, %v90_v14 }
  0x9b   :  { %109 = dma.vmem_to_hbm [thread:$0]  %s102_s0, 512, %s104_s28, [#allocation3], %s182_s2, %s182_s2, %s183_s29  }
  0x9c   :  { %179 = dma.done.wait [#allocation3], 512  }
  0x9d   :  { %180 = vsyncadd [#allocation3], 4294966784 }
  0x9e   :  { %114 = vsyncpa [#allocation3], 1 }

</bundles_post_ra>
